<compile_context>
chip_gen: v7x
topology: tpu7x:2x2x1
jax: 0.10.0
libtpu: 0.0.40
codegen_flags: <defaults>
</compile_context>

<pallas_src>
import functools
import numpy as np
import jax
import jax.numpy as jnp
from jax.experimental import pallas as pl
from jax.experimental.pallas import tpu as pltpu

_VMEM_LIMIT = 32 * 1024 * 1024  # <= physical VMEM on v5e/v6e/v7x


# ----------------------------------------------------------------------------
# Generic tiled linear kernel:  out = act(x @ W + b)
# grid = (cdiv(N, tile_rows),); W and b stay VMEM-resident (constant index_map).
# act in {None, "relu", "logsoftmax"} (logsoftmax is row-wise => tile-safe).
# ----------------------------------------------------------------------------
def _linear_kernel(x_ref, w_ref, b_ref, o_ref, *, activation):
    y = jnp.dot(x_ref[...], w_ref[...], preferred_element_type=jnp.float32)
    y = y + b_ref[...]
    if activation == "relu":
        y = jnp.maximum(y, 0.0)
    elif activation == "logsoftmax":
        m = jnp.max(y, axis=-1, keepdims=True)
        z = y - m
        lse = jnp.log(jnp.sum(jnp.exp(z), axis=-1, keepdims=True))
        y = z - lse
    o_ref[...] = y.astype(o_ref.dtype)


def run_linear(x, w, b, activation=None, row_tile=256):
    N, K = x.shape
    M = w.shape[1]
    tn = N if N <= row_tile else row_tile
    grid = (pl.cdiv(N, tn),)
    kernel = functools.partial(_linear_kernel, activation=activation)
    grid_spec = pltpu.PrefetchScalarGridSpec(
        num_scalar_prefetch=0,
        grid=grid,
        in_specs=[
            pl.BlockSpec((tn, K), lambda i: (i, 0)),   # x row tile
            pl.BlockSpec((K, M), lambda i: (0, 0)),    # W (resident)
            pl.BlockSpec((1, M), lambda i: (0, 0)),    # b (resident)
        ],
        out_specs=pl.BlockSpec((tn, M), lambda i: (i, 0)),
    )
    return pl.pallas_call(
        kernel,
        grid_spec=grid_spec,
        out_shape=jax.ShapeDtypeStruct((N, M), jnp.float32),
        compiler_params=pltpu.CompilerParams(
            dimension_semantics=("parallel",),          # megacore split on v7x
            vmem_limit_bytes=_VMEM_LIMIT),
    )(x, w, b.reshape(1, M))


# ----------------------------------------------------------------------------
# LSTM recurrence over time with packed-sequence masking.
# Input is the PRE-PROJECTED gate input xW[t] = x_t @ W_ih + b (hoisted matmul),
# so the per-step work is only h @ W_hh + elementwise gates.
# grid = (T,) sequential; h/c live in VMEM scratch across grid steps.
# ----------------------------------------------------------------------------
def lstm_step_kernel(xw_ref, len_ref, whh_ref, h0_ref, c0_ref,
                     y_ref, hn_ref, cn_ref, h_sc, c_sc, *, pad_value):
    t = pl.program_id(0)
    t_last = pl.num_programs(0) - 1

    @pl.when(t == 0)
    def _():
        h_sc[...] = h0_ref[...]
        c_sc[...] = c0_ref[...]

    h = h_sc[...]                     # (B, H)
    c = c_sc[...]                     # (B, H)
    H = h.shape[-1]

    # xw_ref[0]: (B, 4H) already contains x_t @ W_ih + (b_ih + b_hh)
    gates = xw_ref[0] + jnp.dot(h, whh_ref[...],
                                preferred_element_type=jnp.float32)

    i_g = jax.nn.sigmoid(gates[:, 0:H])
    f_g = jax.nn.sigmoid(gates[:, H:2 * H])
    g_g = jnp.tanh(gates[:, 2 * H:3 * H])
    o_g = jax.nn.sigmoid(gates[:, 3 * H:4 * H])

    c_new = f_g * c + i_g * g_g
    h_new = o_g * jnp.tanh(c_new)

    valid = len_ref[...] > t          # (B, 1) packed-sequence mask
    h_upd = jnp.where(valid, h_new, h)
    c_upd = jnp.where(valid, c_new, c)

    h_sc[...] = h_upd
    c_sc[...] = c_upd
    # unpacked LSTM output: pad_index at positions past the sequence length
    y_ref[0] = jnp.where(valid, h_new, jnp.float32(pad_value)).astype(y_ref.dtype)

    # last valid state per sequence, written once on the final step
    @pl.when(t == t_last)
    def _():
        hn_ref[...] = h_upd
        cn_ref[...] = c_upd


def run_lstm(xw_tbg, lens, w_hh, h0, c0, pad_value):
    T, B, G = xw_tbg.shape            # G = 4H
    H = w_hh.shape[0]
    kernel = functools.partial(lstm_step_kernel, pad_value=float(pad_value))
    grid_spec = pltpu.PrefetchScalarGridSpec(
        num_scalar_prefetch=0,
        grid=(T,),
        in_specs=[
            pl.BlockSpec((1, B, G), lambda t: (t, 0, 0)),     # xW[t]
            pl.BlockSpec((B, 1), lambda t: (0, 0)),           # seq lengths
            pl.BlockSpec((H, G), lambda t: (0, 0)),           # W_hh (resident)
            pl.BlockSpec((B, H), lambda t: (0, 0)),           # h0
            pl.BlockSpec((B, H), lambda t: (0, 0)),           # c0
        ],
        out_specs=[
            pl.BlockSpec((1, B, H), lambda t: (t, 0, 0)),     # y (T, B, H)
            pl.BlockSpec((B, H), lambda t: (0, 0)),           # h_n
            pl.BlockSpec((B, H), lambda t: (0, 0)),           # c_n
        ],
        scratch_shapes=[pltpu.VMEM((B, H), jnp.float32),
                        pltpu.VMEM((B, H), jnp.float32)],
    )
    return pl.pallas_call(
        kernel,
        grid_spec=grid_spec,
        out_shape=(jax.ShapeDtypeStruct((T, B, H), jnp.float32),
                   jax.ShapeDtypeStruct((B, H), jnp.float32),
                   jax.ShapeDtypeStruct((B, H), jnp.float32)),
        compiler_params=pltpu.CompilerParams(
            dimension_semantics=("arbitrary",),
            vmem_limit_bytes=_VMEM_LIMIT),
    )(xw_tbg, lens, w_hh, h0, c0)


# ----------------------------------------------------------------------------
# Full ShowTell forward
# ----------------------------------------------------------------------------
def show_tell_forward(params, features, input_data, seq_lengths, pad_index):
    """seq_lengths: host list/np array, descending (pack_padded_sequence semantics)."""
    B = features.shape[0]
    H = params["w_enc"].shape[1]
    V = params["w_out"].shape[1]
    t_out = int(max(seq_lengths))                 # pad_packed total_length=None
    tokens = input_data[:, :t_out]                # (B, T)

    # encoder -> initial (h0, c0); dropout = identity in eval
    h0 = run_linear(features, params["w_enc"], params["b_enc"], activation="relu")
    c0 = h0

    # embedding lookup directly in (T, B, H) layout (no big activation transpose)
    x_emb = jnp.take(params["embedding"], tokens.T, axis=0)        # (T, B, H)

    # Hoisted input projection: one batched MXU matmul over all T*B rows,
    # bias (b_ih + b_hh) folded in here so the recurrent kernel skips it.
    xw = run_linear(x_emb.reshape(t_out * B, H),
                    params["w_ih"], params["b_lstm"])              # (T*B, 4H)
    xw = xw.reshape(t_out, B, 4 * H)

    lens = jnp.asarray(seq_lengths, jnp.int32).reshape(B, 1)
    y_tbh, h_n, c_n = run_lstm(xw, lens, params["w_hh"], h0, c0, pad_index)

    # One (T,B,H)->(B,T,H) transpose remains so the vocab projection output is
    # directly (B, T, V) with no post-transpose of the (larger) logits tensor.
    y = jnp.transpose(y_tbh, (1, 0, 2)).reshape(B * t_out, H)

    logp = run_linear(y, params["w_out"], params["b_out"], activation="logsoftmax")
    logp = logp.reshape(B, t_out, V)
    return logp, (h_n[None], c_n[None])


# ----------------------------------------------------------------------------
# Pure-JAX reference (for correctness check)
# ----------------------------------------------------------------------------
def reference_forward(params, features, input_data, seq_lengths, pad_index):
    H = params["w_enc"].shape[1]
    t_out = int(max(seq_lengths))
    tokens = input_data[:, :t_out]
    h0 = jax.nn.relu(features @ params["w_enc"] + params["b_enc"])
    c0 = h0
    emb = params["embedding"][tokens]                              # (B, T, H)
    lens = jnp.asarray(seq_lengths, jnp.int32)

    def step(carry, inp):
        h, c = carry
        xt, t = inp
        gates = xt @ params["w_ih"] + h @ params["w_hh"] + params["b_lstm"]
        i = jax.nn.sigmoid(gates[:, :H])
        f = jax.nn.sigmoid(gates[:, H:2 * H])
        g = jnp.tanh(gates[:, 2 * H:3 * H])
        o = jax.nn.sigmoid(gates[:, 3 * H:])
        c_new = f * c + i * g
        h_new = o * jnp.tanh(c_new)
        m = (lens > t)[:, None]
        h2 = jnp.where(m, h_new, h)
        c2 = jnp.where(m, c_new, c)
        y = jnp.where(m, h_new, float(pad_index))
        return (h2, c2), y

    (hn, cn), ys = jax.lax.scan(step, (h0, c0),
                                (jnp.transpose(emb, (1, 0, 2)), jnp.arange(t_out)))
    y = jnp.transpose(ys, (1, 0, 2))
    logits = y @ params["w_out"] + params["b_out"]
    return jax.nn.log_softmax(logits, axis=-1), (hn[None], cn[None])


# ----------------------------------------------------------------------------
if __name__ == "__main__":
    B, F, H, V, T = 2, 64, 32, 64, 8
    pad_index = 0
    seq_lengths = [8, 5]                # descending (enforce_sorted=True)

    key = jax.random.PRNGKey(0)
    ks = jax.random.split(key, 10)
    scale = 0.1
    params = {
        "w_enc": scale * jax.random.normal(ks[0], (F, H), jnp.float32),
        "b_enc": scale * jax.random.normal(ks[1], (H,), jnp.float32),
        "embedding": scale * jax.random.normal(ks[2], (V, H), jnp.float32),
        "w_ih": scale * jax.random.normal(ks[3], (H, 4 * H), jnp.float32),
        "w_hh": scale * jax.random.normal(ks[4], (H, 4 * H), jnp.float32),
        # b_ih + b_hh combined
        "b_lstm": scale * (jax.random.normal(ks[5], (4 * H,), jnp.float32)
                           + jax.random.normal(ks[6], (4 * H,), jnp.float32)),
        "w_out": scale * jax.random.normal(ks[7], (H, V), jnp.float32),
        "b_out": scale * jax.random.normal(ks[8], (V,), jnp.float32),
    }

    features = jax.random.normal(ks[9], (B, F), jnp.float32)
    input_data = jax.random.randint(jax.random.PRNGKey(1), (B, T), 0, V, jnp.int32)

    logp, (h_n, c_n) = show_tell_forward(params, features, input_data,
                                         seq_lengths, pad_index)
    jax.block_until_ready((logp, h_n, c_n))

    ref_logp, (ref_h, ref_c) = reference_forward(params, features, input_data,
                                                 seq_lengths, pad_index)
    np.testing.assert_allclose(np.asarray(logp), np.asarray(ref_logp),
                               rtol=1e-4, atol=1e-4)
    np.testing.assert_allclose(np.asarray(h_n), np.asarray(ref_h),
                               rtol=1e-4, atol=1e-4)
    np.testing.assert_allclose(np.asarray(c_n), np.asarray(ref_c),
                               rtol=1e-4, atol=1e-4)

    print("KERNEL_OK")
</pallas_src>

<mosaic_0001>
module attributes {stable_mosaic.version = 11 : i64} {
  func.func @_linear_kernel(%arg0: i32, %arg1: memref<2x64xf32, #tpu.memory_space<vmem>>, %arg2: memref<64x32xf32, #tpu.memory_space<vmem>>, %arg3: memref<1x32xf32, #tpu.memory_space<vmem>>, %arg4: memref<2x32xf32, #tpu.memory_space<vmem>>) attributes {dimension_semantics = [#tpu.dimension_semantics<parallel>], iteration_bounds = array<i64: 1>, scalar_prefetch = 0 : i64, scratch_operands = 0 : i64, tpu.core_type = #tpu.core_type<tc>, window_params = [{transform_indices = @transform_0, window_bounds = array<i64: 2, 64>}, {pipeline_mode = #tpu.pipeline_mode<synchronous>, transform_indices = @transform_1, window_bounds = array<i64: 64, 32>}, {pipeline_mode = #tpu.pipeline_mode<synchronous>, transform_indices = @transform_2, window_bounds = array<i64: 1, 32>}, {transform_indices = @transform_3, window_bounds = array<i64: 2, 32>}]} {
    %c0 = arith.constant 0 : index
    %c0_0 = arith.constant 0 : index
    %0 = vector.load %arg1[%c0, %c0_0] : memref<2x64xf32, #tpu.memory_space<vmem>>, vector<2x64xf32>
    %c0_1 = arith.constant 0 : index
    %c0_2 = arith.constant 0 : index
    %1 = vector.load %arg2[%c0_1, %c0_2] : memref<64x32xf32, #tpu.memory_space<vmem>>, vector<64x32xf32>
    %cst = arith.constant dense<0.000000e+00> : vector<2x32xf32>
    %2 = tpu.matmul %0, %1, %cst {dimension_numbers = #tpu.dot_dimension_numbers<[1], [0], [0], [1], [0, 0, 1, 1], [], []>} : vector<2x64xf32>, vector<64x32xf32>, vector<2x32xf32> -> vector<2x32xf32>
    %c0_3 = arith.constant 0 : index
    %c0_4 = arith.constant 0 : index
    %3 = vector.load %arg3[%c0_3, %c0_4] : memref<1x32xf32, #tpu.memory_space<vmem>>, vector<1x32xf32>
    %4 = vector.broadcast %3 : vector<1x32xf32> to vector<2x32xf32>
    %5 = arith.addf %2, %4 : vector<2x32xf32>
    %cst_5 = arith.constant 0.000000e+00 : f32
    %6 = vector.broadcast %cst_5 : f32 to vector<2x32xf32>
    %7 = arith.maximumf %5, %6 : vector<2x32xf32>
    %c0_6 = arith.constant 0 : index
    %c0_7 = arith.constant 0 : index
    %8 = vector.load %arg4[%c0_6, %c0_7] : memref<2x32xf32, #tpu.memory_space<vmem>>, vector<2x32xf32>
    tpu.vector_store %arg4[%c0_6, %c0_7], %7 {strides = array<i32>} : memref<2x32xf32, #tpu.memory_space<vmem>>, vector<2x32xf32>,
    return
  }
  func.func @transform_0(%arg0: i32) -> (i32, i32) {
    %c0_i32 = arith.constant 0 : i32
    %c0_i32_0 = arith.constant 0 : i32
    return %arg0, %c0_i32 : i32, i32
  }
  func.func @transform_1(%arg0: i32) -> (i32, i32) {
    %c0_i32 = arith.constant 0 : i32
    %c0_i32_0 = arith.constant 0 : i32
    %c0_i32_1 = arith.constant 0 : i32
    return %c0_i32, %c0_i32_0 : i32, i32
  }
  func.func @transform_2(%arg0: i32) -> (i32, i32) {
    %c0_i32 = arith.constant 0 : i32
    %c0_i32_0 = arith.constant 0 : i32
    %c0_i32_1 = arith.constant 0 : i32
    return %c0_i32, %c0_i32_0 : i32, i32
  }
  func.func @transform_3(%arg0: i32) -> (i32, i32) {
    %c0_i32 = arith.constant 0 : i32
    %c0_i32_0 = arith.constant 0 : i32
    return %arg0, %c0_i32 : i32, i32
  }
}

</mosaic_0001>

<bundles_post_ra>
// kernel: tpu_custom_call.1
= control target key start
LH: loop header
LB: loop body
LE: loop exit
PB: predicated region body
PF: predicated region fallthrough
CT: control target
= control target key end

     0   :  { %v192_v3 = vmov 0.0|0.0   ;;  %vm193_vm0 = vmmov 0   ;;  %v194_v6 = vmov 0.0   ;;  %s258_s0 = inlined_call_operand.vmem [shape: f32[2,64], index: 0, kind: input, shape index: {}]   ;;  %s259_s1 = inlined_call_operand.vmem [shape: f32[64,32], index: 1, kind: input, shape index: {}]   ;;  %s260_s2 = inlined_call_operand.vmem [shape: f32[1,32], index: 2, kind: input, shape index: {}]   ;;  %s261_s3 = inlined_call_operand.hbm [shape: f32[2,32], index: 3, kind: output, shape index: {}]  }
   0x1   :  { %v16_v0 = vld [vmem:[%s259_s1] sm:$0xff]  ;;  %v17_v1 = vld [vmem:[%s259_s1 + $0x8] sm:$0xff]  ;;  %v18_v2 = vld [vmem:[%s259_s1 + $0x10] sm:$0xff]  ;;  %152 = vmatprep.subr.bf16.mxu0 %v192_v3  ;;  %149 = vmatprep.mubr.msk.f32.mxu0 %vm193_vm0, %v194_v6 }
   0x2   :  { %v153_v4 = vpack.c.bf16 %v17_v1, %v16_v0  ;;  %v19_v5 = vld [vmem:[%s259_s1 + $0x18] sm:$0xff] }
   0x3   :  { %v156_v7 = vpack.c.bf16 %v19_v5, %v18_v2 }
   0x4   :  { %154 = vmatpush3.bf16.msra.mxu0 %v153_v4 }
   0x5   :  { %8 = vsyncpa [#allocation3], 0  ;;  %155 = vmatprep.subr.bf16.mxu0 %v192_v3  ;;  %v20_v8 = vld [vmem:[%s259_s1 + $0x20] sm:$0xff]  ;;  %v21_v9 = vld [vmem:[%s259_s1 + $0x28] sm:$0xff]  ;;  %vm31_vm1 = vcmask 523264   ;;  %s195_s5 = smov [#allocation2]  }
   0x6   :  { %v159_v10 = vpack.c.bf16 %v21_v9, %v20_v8  ;;  %v22_v11 = vld [vmem:[%s259_s1 + $0x30] sm:$0xff]  ;;  %v23_v12 = vld [vmem:[%s259_s1 + $0x38] sm:$0xff]  ;;  %v15_v14 = vld [vmem:[%s258_s0] sm:$0x3]  ;;  %s114_s6 = sshll.u32 %s195_s5, 4  ;;  %vm106_vm2 = vcmask 254976   ;;  %s115_s6 = int_to_ptr.vmem [resolvable:$true] %s114_s6 }
   0x7   :  { %v162_v13 = vpack.c.bf16 %v23_v12, %v22_v11  ;;  %v122_v15 = vld [vmem:[%s260_s2] ss:$0 sm:$0xff]  ;;  %s168_s1 = scalar_lea.vmem %s115_s6, 32  ;;  %p173_p1 = scmp.lt.s32.totalorder %s115_s6, %s115_s6 }
   0x8   :  { %157 = vmatpush3.bf16.msra.mxu0 %v156_v7  ;;  %p169_p0 = scmp.ne.s32.totalorder %s115_s6, %s168_s1  ;;  %p174_p2 = scmp.lt.s32.totalorder %s168_s1, %s168_s1 }
   0x9   :  { %158 = vmatprep.subr.bf16.mxu0 %v192_v3 }
   0xa   :  { %p175_p3 = por %p174_p2, %p173_p1 }
   0xc   :  { %160 = vmatpush3.bf16.msra.mxu0 %v159_v10  ;;  %p176_p4 = pnand %p175_p3, %p169_p0 }
   0xd   :  { %161 = vmatprep.subr.bf16.mxu0 %v192_v3 }
  0x10   :  { %163 = vmatpush3.bf16.msra.mxu0 %v162_v13 }
  0x13   :  { %150 = vmatmul.mubr.msk.f32.vlgmr.msra.gmra.mrb[0].mxu0 %vm31_vm1, %v15_v14 }
  0xe6   :  { %v101_v16 = vpop.f32.mrb[0].mxu0 }
  0xe7   :  { %v102_v17 = vadd.f32 %v122_v15, %v101_v16  ;;  %v151_v18 = vpop.f32.mrb[1].mxu0 }
  0xe9   :  { %v105_v19 = vmax.f32 %v102_v17, 0.0 }
  0xeb   :  { %107 = vst.msk [vmem:[#allocation2] sm:$0x3] %vm106_vm2, %v105_v19 }
  0xec   :  { %179 = shalt.err (!%p176_p4)
}
  0xed   :  { %s180_s2 = scalar_lea.hbm %s261_s3, 32 }
  0xee   :  { %p181_p5 = scmp.ne.s32.totalorder %s261_s3, %s180_s2  ;;  %p184_p6 = scmp.lt.u32.totalorder %s180_s2, %s261_s3 }
  0xf0   :  { %p186_p7 = pnand %p184_p6, %p181_p5 }
  0xf2   :  { %189 = shalt.err (!%p186_p7)
}
  0xf3   :  { %117 = dma.vmem_to_hbm [thread:$0]  %s115_s6, 32, %s261_s3, [#allocation3]  }
  0xf4   :  { %190 = dma.done.wait [#allocation3], 32  }
  0xf5   :  { %191 = vsyncadd [#allocation3], 4294967264 }
  0xf6   :  { %121 = vsyncpa [#allocation3], 1 }

</bundles_post_ra>
